<compile_context>
chip_gen: v5e
topology: v5e:2x2
jax: 0.10.0
libtpu: 0.0.40
codegen_flags: <defaults>
</compile_context>

<pallas_src>
import functools
import math

import jax
import jax.numpy as jnp
from jax.experimental import pallas as pl
from jax.experimental.pallas import tpu as pltpu


def _smooth_kernel(t_ref, x_ref, o_ref, *, confidence, fill, ignore_index, entropy):
    """KL(label-smoothed one-hot || exp(x)) summed over classes, per row.

    loss_i = entropy                                  (host-computed constant)
             - fill * sum_j x[i, j]
             - (confidence - fill) * x[i, t_i]
             + fill * x[i, ignore_index]              (only if ignore_index >= 0)
    and loss_i = 0 where t_i == ignore_index          (only if ignore_index >= 0)
    """
    x = x_ref[...]                          # (R, V), native dtype (f32 or bf16)
    t = t_ref[...]                          # (R, 1) int32
    col = jax.lax.broadcasted_iota(jnp.int32, x.shape, 1)

    # Row sum and target-column pick, accumulated in f32.
    rowsum = jnp.sum(x, axis=-1, keepdims=True, dtype=jnp.float32)
    x_tgt = jnp.sum(jnp.where(col == t, x, 0), axis=-1, keepdims=True,
                    dtype=jnp.float32)

    loss = entropy - fill * rowsum - (confidence - fill) * x_tgt
    if ignore_index >= 0:
        # Static lane slice of the ignore column (its tmp entry is 0, not fill).
        x_ign = x[:, ignore_index:ignore_index + 1].astype(jnp.float32)
        loss = loss + fill * x_ign
        # Rows whose target is the ignore index contribute 0.
        loss = jnp.where(t == ignore_index, 0.0, loss)

    o_ref[...] = loss


def _pick_block_rows(n_rows, n_classes, itemsize, *, input_budget_bytes=24 << 20,
                     max_rows=2048):
    """Largest row tile that (a) keeps the double-buffered input under the VMEM
    budget, (b) keeps >= 2 grid steps when possible (v7x megacore), and
    (c) is a multiple of 8 (16 for sub-32-bit dtypes) dividing n_rows."""
    cap = max(1, input_budget_bytes // (2 * n_classes * itemsize))  # 2x: double buffer
    cap = min(cap, max_rows, n_rows)
    if n_rows >= 16:
        cap = min(cap, n_rows // 2)         # keep at least 2 grid steps
    step = 16 if itemsize < 4 else 8        # bf16 sublane packing wants 16
    br = (cap // step) * step
    while br >= step and n_rows % br:
        br -= step
    if br < step or n_rows % br:
        br = n_rows                          # full-extent block is always legal
    return br


class LabelSmoothingLoss:
    """Pallas-backed equivalent of the PyTorch LabelSmoothingLoss forward."""

    def __init__(self, n_labels, smoothing=0.0, ignore_index=-100):
        assert 0 <= smoothing <= 1
        self.n_labels = int(n_labels)
        self.smoothing = float(smoothing)
        self.confidence = 1.0 - float(smoothing)
        self.ignore_index = int(ignore_index)
        if self.smoothing > 0:
            n_ignore_idxs = 1 + (self.ignore_index >= 0)
            self.fill = self.smoothing / (self.n_labels - n_ignore_idxs)
            # sum_j xlogy(tmp_j, tmp_j) for a non-ignored row (xlogy(0, 0) == 0).
            n_fill_cols = self.n_labels - 1 - (self.ignore_index >= 0)
            ent = n_fill_cols * self.fill * math.log(self.fill)
            if self.confidence > 0:
                ent += self.confidence * math.log(self.confidence)
            self.entropy = float(ent)
        else:
            self.fill = 0.0
            self.entropy = 0.0

    def __call__(self, log_inputs, targets, *, block_rows=None,
                 input_vmem_budget_bytes=24 << 20, vmem_limit_bytes=40 << 20):
        N, V = log_inputs.shape
        assert V == self.n_labels
        targets = targets.astype(jnp.int32)

        if self.confidence == 1.0:
            # smoothing == 0 -> NLLLoss(reduction='none', ignore_index).
            # Per perf review: a gather reads ~V x less HBM than streaming the
            # full (N, V) matrix through a kernel, on every TPU generation.
            idx = jnp.clip(targets, 0, V - 1)[:, None]
            picked = jnp.take_along_axis(log_inputs, idx, axis=-1)[:, 0]
            return jnp.where(targets == self.ignore_index,
                             jnp.zeros_like(picked), -picked)

        itemsize = jnp.dtype(log_inputs.dtype).itemsize
        if block_rows is None:
            block_rows = _pick_block_rows(
                N, V, itemsize, input_budget_bytes=input_vmem_budget_bytes)
        assert N % block_rows == 0, "block_rows must divide N"
        grid = (N // block_rows,)

        kern = functools.partial(
            _smooth_kernel,
            confidence=self.confidence,
            fill=self.fill,
            ignore_index=self.ignore_index,
            entropy=self.entropy,
        )

        out = pl.pallas_call(
            kern,
            out_shape=jax.ShapeDtypeStruct((N, 1), jnp.float32),
            grid=grid,
            in_specs=[
                # Targets left as a tiny per-block DMA (review: "leave as-is").
                pl.BlockSpec((block_rows, 1), lambda i: (i, 0)),   # targets
                pl.BlockSpec((block_rows, V), lambda i: (i, 0)),   # log_inputs
            ],
            out_specs=pl.BlockSpec((block_rows, 1), lambda i: (i, 0)),
            compiler_params=pltpu.CompilerParams(
                dimension_semantics=("parallel",),
                vmem_limit_bytes=int(vmem_limit_bytes),
            ),
        )(targets.reshape(N, 1), log_inputs)
        return out[:, 0]


def _reference(log_inputs, targets, n_labels, smoothing, ignore_index):
    """Pure-JAX reference mirroring the PyTorch forward."""
    confidence = 1.0 - smoothing
    N = targets.shape[0]
    if confidence < 1:
        n_ignore_idxs = 1 + (ignore_index >= 0)
        fill = smoothing / (n_labels - n_ignore_idxs)
        tmp = jnp.full((N, n_labels), fill, jnp.float32)
        if ignore_index >= 0:
            tmp = tmp.at[:, ignore_index].set(0.0)
        tmp = tmp.at[jnp.arange(N), targets].set(confidence)
        if ignore_index >= 0:
            tmp = jnp.where((targets == ignore_index)[:, None], 0.0, tmp)
        safe = jnp.where(tmp > 0, tmp, 1.0)
        kl = jnp.where(tmp > 0, tmp * jnp.log(safe), 0.0) - tmp * log_inputs
        return kl.sum(-1)
    else:
        res = -log_inputs[jnp.arange(N), targets]
        return jnp.where(targets == ignore_index, 0.0, res)


if __name__ == "__main__":
    key = jax.random.PRNGKey(0)
    N, V = 16, 32
    k1, k2 = jax.random.split(key)

    logits = jax.random.normal(k1, (N, V), dtype=jnp.float32)
    log_inputs = jax.nn.log_softmax(logits, axis=-1)
    targets = jax.random.randint(k2, (N,), 0, V, dtype=jnp.int32)
    ignore_index = 3
    targets = targets.at[0].set(ignore_index)  # exercise the row-zeroing path

    # --- smoothing > 0, ignore_index >= 0 (KLDivLoss + ignore column/row) ---
    loss_mod = LabelSmoothingLoss(n_labels=V, smoothing=0.1, ignore_index=ignore_index)
    got = jax.block_until_ready(loss_mod(log_inputs, targets))
    want = _reference(log_inputs, targets, V, 0.1, ignore_index)
    assert got.shape == (N,)
    assert jnp.allclose(got, want, atol=1e-4, rtol=1e-4), (got, want)

    # --- smoothing > 0, ignore_index < 0 (no ignore handling) ---
    loss_mod_ni = LabelSmoothingLoss(n_labels=V, smoothing=0.2, ignore_index=-100)
    got_ni = jax.block_until_ready(loss_mod_ni(log_inputs, targets))
    want_ni = _reference(log_inputs, targets, V, 0.2, -100)
    assert jnp.allclose(got_ni, want_ni, atol=1e-4, rtol=1e-4), (got_ni, want_ni)

    # --- smoothing == 0 (NLLLoss via gather), with and without ignored rows ---
    loss_mod0 = LabelSmoothingLoss(n_labels=V, smoothing=0.0, ignore_index=-100)
    got0 = jax.block_until_ready(loss_mod0(log_inputs, targets))
    want0 = _reference(log_inputs, targets, V, 0.0, -100)
    assert jnp.allclose(got0, want0, atol=1e-5, rtol=1e-5), (got0, want0)

    loss_mod0i = LabelSmoothingLoss(n_labels=V, smoothing=0.0, ignore_index=ignore_index)
    got0i = jax.block_until_ready(loss_mod0i(log_inputs, targets))
    want0i = _reference(log_inputs, targets, V, 0.0, ignore_index)
    assert jnp.allclose(got0i, want0i, atol=1e-5, rtol=1e-5), (got0i, want0i)

    print("KERNEL_OK")
</pallas_src>

<mosaic_0001>
module attributes {stable_mosaic.version = 11 : i64} {
  func.func @_smooth_kernel(%arg0: i32, %arg1: memref<8x1xi32, #tpu.memory_space<vmem>>, %arg2: memref<8x32xf32, #tpu.memory_space<vmem>>, %arg3: memref<8x1xf32, #tpu.memory_space<vmem>>) attributes {dimension_semantics = [#tpu.dimension_semantics<parallel>], iteration_bounds = array<i64: 2>, scalar_prefetch = 0 : i64, scratch_operands = 0 : i64, tpu.core_type = #tpu.core_type<tc>, window_params = [{transform_indices = @transform_0, window_bounds = array<i64: 8, 1>}, {transform_indices = @transform_1, window_bounds = array<i64: 8, 32>}, {transform_indices = @transform_2, window_bounds = array<i64: 8, 1>}]} {
    %c0 = arith.constant 0 : index
    %c0_0 = arith.constant 0 : index
    %0 = vector.load %arg2[%c0, %c0_0] : memref<8x32xf32, #tpu.memory_space<vmem>>, vector<8x32xf32>
    %c0_1 = arith.constant 0 : index
    %c0_2 = arith.constant 0 : index
    %1 = vector.load %arg1[%c0_1, %c0_2] : memref<8x1xi32, #tpu.memory_space<vmem>>, vector<8x1xi32>
    %2 = tpu.iota {dimensions = array<i32: 1>} : vector<8x32xi32>
    %cst = arith.constant dense<0.000000e+00> : vector<8xf32>
    %3 = vector.multi_reduction <add>, %0, %cst [1] : vector<8x32xf32> to vector<8xf32>
    %4 = vector.shape_cast %3 : vector<8xf32> to vector<8x1xf32>
    %5 = vector.broadcast %1 : vector<8x1xi32> to vector<8x32xi32>
    %6 = arith.cmpi eq, %2, %5 : vector<8x32xi32>
    %c0_i32 = arith.constant 0 : i32
    %7 = arith.sitofp %c0_i32 : i32 to f32
    %8 = vector.broadcast %7 : f32 to vector<8x32xf32>
    %9 = arith.select %6, %0, %8 : vector<8x32xi1>, vector<8x32xf32>
    %cst_3 = arith.constant dense<0.000000e+00> : vector<8xf32>
    %10 = vector.multi_reduction <add>, %9, %cst_3 [1] : vector<8x32xf32> to vector<8xf32>
    %11 = vector.shape_cast %10 : vector<8xf32> to vector<8x1xf32>
    %cst_4 = arith.constant 0.00333333341 : f32
    %12 = vector.broadcast %cst_4 : f32 to vector<8x1xf32>
    %13 = arith.mulf %12, %4 : vector<8x1xf32>
    %cst_5 = arith.constant -0.665202737 : f32
    %14 = vector.broadcast %cst_5 : f32 to vector<8x1xf32>
    %15 = arith.subf %14, %13 : vector<8x1xf32>
    %cst_6 = arith.constant 0.896666646 : f32
    %16 = vector.broadcast %cst_6 : f32 to vector<8x1xf32>
    %17 = arith.mulf %16, %11 : vector<8x1xf32>
    %18 = arith.subf %15, %17 : vector<8x1xf32>
    %19 = vector.extract_strided_slice %0 {offsets = [0, 3], sizes = [8, 1], strides = [1, 1]} : vector<8x32xf32> to vector<8x1xf32>
    %cst_7 = arith.constant 0.00333333341 : f32
    %20 = vector.broadcast %cst_7 : f32 to vector<8x1xf32>
    %21 = arith.mulf %20, %19 : vector<8x1xf32>
    %22 = arith.addf %18, %21 : vector<8x1xf32>
    %c3_i32 = arith.constant 3 : i32
    %23 = vector.broadcast %c3_i32 : i32 to vector<8x1xi32>
    %24 = arith.cmpi eq, %1, %23 : vector<8x1xi32>
    %cst_8 = arith.constant 0.000000e+00 : f32
    %25 = vector.broadcast %cst_8 : f32 to vector<8x1xf32>
    %26 = arith.select %24, %25, %22 : vector<8x1xi1>, vector<8x1xf32>
    %c0_9 = arith.constant 0 : index
    %c0_10 = arith.constant 0 : index
    %27 = vector.load %arg3[%c0_9, %c0_10] : memref<8x1xf32, #tpu.memory_space<vmem>>, vector<8x1xf32>
    tpu.vector_store %arg3[%c0_9, %c0_10], %26 {strides = array<i32>} : memref<8x1xf32, #tpu.memory_space<vmem>>, vector<8x1xf32>,
    return
  }
  func.func @transform_0(%arg0: i32) -> (i32, i32) {
    %c0_i32 = arith.constant 0 : i32
    %c0_i32_0 = arith.constant 0 : i32
    return %arg0, %c0_i32 : i32, i32
  }
  func.func @transform_1(%arg0: i32) -> (i32, i32) {
    %c0_i32 = arith.constant 0 : i32
    %c0_i32_0 = arith.constant 0 : i32
    return %arg0, %c0_i32 : i32, i32
  }
  func.func @transform_2(%arg0: i32) -> (i32, i32) {
    %c0_i32 = arith.constant 0 : i32
    %c0_i32_0 = arith.constant 0 : i32
    return %arg0, %c0_i32 : i32, i32
  }
}

</mosaic_0001>

<bundles_post_ra>
// kernel: tpu_custom_call.1
= control target key start
LH: loop header
LB: loop body
LE: loop exit
PB: predicated region body
PF: predicated region fallthrough
CT: control target
= control target key end

     0   :  { %s297_s9 = smov 0   ;;  %s322_s0 = inlined_call_operand.vmem [shape: s32[16,1], index: 0, kind: input, shape index: {}]   ;;  %s323_s1 = inlined_call_operand.vmem [shape: f32[16,32], index: 1, kind: input, shape index: {}]   ;;  %s324_s2 = inlined_call_operand.vmem [shape: f32[16,1], index: 2, kind: output, shape index: {}]  }
   0x1 LB: > { %s251_s10 = sadd.s32 4294967295, %s278_s9   ;;  %p255_p0 = scmp.ge.s32.totalorder %s278_s9, 1  ;;  %s278_s9 = sphi %s297_s9, %s12_s9  }
   0x2   : > { %p120_p1 = scmp.lt.s32.totalorder %s278_s9, 3 }
   0x4   : > { %p121_p2 = pnand %p255_p0, %p120_p1 }
   0x5   : > { %p144_p3 = scmp.lt.s32.totalorder (!%p121_p2), %s251_s10, 1  ;;  %s281_s18 = smov (!%p121_p2), 125  }
   0x6   : > { %124 = sbr.rel (%p121_p2) target bundleno = 372 (0x174), region = 28 }
   0xb   : > { %v280_v0 = vmov 0   ;;  %s326_s10 = smov (!%p144_p3, %s251_s10), 1  ;;  %vm160_vm0 = vcmask 261120   ;;  %v158_v4 = vlaneseq  ;;  %vm184_vm3 = vcmask 7168  }
   0xc   : > { %271 = vset.pattern.permute.xlu0 %v280_v0  ;;  %s305_s11 = sshll.u32 %s326_s10, 3 }
   0xd   : > { %s147_s14 = scalar_lea.vmem %s322_s0, %s305_s11  ;;  %s151_s17 = scalar_lea.vmem %s323_s1, %s305_s11  ;;  %v159_v5 = vand.u32 127, %v158_v4 }
   0xe   : > { %v157_v1 = vld [vmem:[%s147_s14] sm:$0xff]  ;;  %s155_s21 = scalar_lea.vmem %s324_s2, %s305_s11 }
   0xf   : > { %165 = vperm.xlu0 %271, %v157_v1   ;;  %v156_v2 = vld [vmem:[%s151_s17] sm:$0xff]  ;;  %vm178_vm2 = vcmp.eq.s32.totalorder %v157_v1, 3 }
  0x10   : > { %v161_v3 = vsel %vm160_vm0, %v156_v2, 0.0  ;;  %v176_v13 = vmul.f32 0.0033333334, %v156_v2 }
  0x39   : > { %162 = vadd.xlane.f32.xlu0 %v161_v3 }
  0x81   : > { %v166_v6 = vpop.permute.xlu0 %165 }
  0x82   : > { %vm167_vm1 = vcmp.eq.s32.totalorder %v159_v5, %v166_v6 }
  0x83   : > { %v168_v7 = vsel %vm167_vm1, %v156_v2, 0.0 }
  0x84   : > { %v169_v8 = vsel %vm160_vm0, %v168_v7, 0.0 }
  0x85   : > { %170 = vadd.xlane.f32.xlu1 %v169_v8 }
  0xac   : > { %v163_v9 = vpop.xlane.xlu0 %162 }
  0xad   : > { %v172_v10 = vmul.f32 0.0033333334, %v163_v9 }
  0xaf   : > { %v173_v11 = vsub.f32 -0.66520274, %v172_v10 }
  0xf8   : > { %v171_v12 = vpop.xlane.xlu1 %170 }
  0xf9   : > { %v174_v14 = vmul.f32 0.89666665, %v171_v12 }
  0xfb   : > { %v175_v15 = vsub.f32 %v173_v11, %v174_v14 }
  0xfd   : > { %v177_v16 = vadd.f32 %v176_v13, %v175_v15 }
  0xff   : > { %180 = vrot.lane.b32.xlu1 %v177_v16, %s281_s18 }
 0x171   : > { %v181_v17 = vpop.permute.xlu1 %180 }
 0x172   : > { %v183_v18 = vsel %vm178_vm2, 0.0, %v181_v17 }
 0x173   : > { %185 = vst.msk [vmem:[%s155_s21] sm:$0xff] %vm184_vm3, %v183_v18 }
 0x174 PF: > { %s12_s9 = sadd.s32 1, %s278_s9  }
 0x175   : > { %p9_p4 = scmp.ge.s32.totalorder %s12_s9, 4  }
 0x177   :  { %11 = sbr.rel (!%p9_p4) target bundleno = 1 (0x1), region = 61 }

</bundles_post_ra>
